<compile_context>
chip_gen: v6e
topology: v6e:2x2x1
jax: 0.10.0
libtpu: 0.0.40
codegen_flags: <defaults>
</compile_context>

<pallas_src>
import jax
import jax.numpy as jnp
from jax.experimental import pallas as pl
from jax.experimental.pallas import tpu as pltpu


def _dma_copy_kernel(x_hbm, o_hbm, sem):
    # One chunk per grid step: whole-chunk HBM->HBM async copy.
    i = pl.program_id(0)
    cp = pltpu.make_async_copy(x_hbm.at[i], o_hbm.at[i], sem)
    cp.start()
    cp.wait()


def _num_chunks(total):
    # >= 2 chunks so the two TensorCores on v7x each issue DMAs; more chunks
    # only adds issue overhead for a pure memcpy. Falls back to 1 chunk when
    # the element count is not evenly divisible (DMA path has no lane
    # constraint, so no special-case layout is needed).
    for c in (4, 2):
        if total % c == 0:
            return c
    return 1


def split_cat(x):
    """torch.split(x, [1,1,1], dim=1) + torch.cat(dim=1) == identity copy."""
    N, C, H, W = x.shape
    assert C == 3, "forward() splits dim=1 into [1,1,1] -> requires 3 channels"
    total = N * C * H * W
    chunks = _num_chunks(total)
    xf = x.reshape(chunks, total // chunks)

    out = pl.pallas_call(
        _dma_copy_kernel,
        out_shape=jax.ShapeDtypeStruct(xf.shape, xf.dtype),
        grid=(chunks,),
        in_specs=[pl.BlockSpec(memory_space=pl.ANY)],
        out_specs=pl.BlockSpec(memory_space=pl.ANY),
        scratch_shapes=[pltpu.SemaphoreType.DMA],
        input_output_aliases={0: 0},
        compiler_params=pltpu.CompilerParams(
            dimension_semantics=("parallel",),
        ),
    )(xf)
    return out.reshape(N, C, H, W)


# jit + donation: reshapes fuse away as bitcasts and the input buffer can be
# reused for the aliased output (no defensive copy, ~zero extra HBM traffic).
split_cat_jit = jax.jit(split_cat, donate_argnums=(0,))


if __name__ == "__main__":
    # Note: the module's three Conv2d layers are defined but never used in
    # forward(); they do not participate in the computation and are omitted.
    key = jax.random.PRNGKey(0)
    x = jax.random.normal(key, (2, 3, 16, 16), jnp.float32)

    expected = jnp.copy(x)  # snapshot: x is donated to the kernel call below
    out = jax.block_until_ready(split_cat_jit(x))

    # Reference: split([1,1,1], dim=1) + cat(dim=1) is an identity copy.
    assert out.shape == expected.shape
    assert bool(jnp.array_equal(out, expected))
    print("KERNEL_OK")
</pallas_src>

<mosaic_0001>
module attributes {stable_mosaic.version = 11 : i64} {
  func.func @_dma_copy_kernel(%arg0: i32, %arg1: memref<4x384xf32, #tpu.memory_space<any>>, %arg2: memref<4x384xf32, #tpu.memory_space<any>>, %arg3: memref<!tpu.dma_semaphore, #tpu.memory_space<semaphore_mem>>) attributes {dimension_semantics = [#tpu.dimension_semantics<parallel>], iteration_bounds = array<i64: 4>, scalar_prefetch = 0 : i64, scratch_operands = 1 : i64, tpu.core_type = #tpu.core_type<tc>, window_params = [{}, {}]} {
    %c0_i32 = arith.constant 0 : i32
    %0 = tpu.memref_slice %arg1[%arg0, %c0_i32] : memref<4x384xf32, #tpu.memory_space<any>> -> memref<1x384xf32, #tpu.memory_space<any>>
    %1 = tpu.memref_squeeze %0 : memref<1x384xf32, #tpu.memory_space<any>> -> memref<384xf32, #tpu.memory_space<any>>
    %c0_i32_0 = arith.constant 0 : i32
    %2 = tpu.memref_slice %arg2[%arg0, %c0_i32_0] : memref<4x384xf32, #tpu.memory_space<any>> -> memref<1x384xf32, #tpu.memory_space<any>>
    %3 = tpu.memref_squeeze %2 : memref<1x384xf32, #tpu.memory_space<any>> -> memref<384xf32, #tpu.memory_space<any>>
    tpu.enqueue_dma source(%1 : memref<384xf32, #tpu.memory_space<any>>) target(%3 : memref<384xf32, #tpu.memory_space<any>>) target_semaphore(%arg3 : memref<!tpu.dma_semaphore, #tpu.memory_space<semaphore_mem>>)
    %c0_i32_1 = arith.constant 0 : i32
    %4 = tpu.memref_slice %arg1[%arg0, %c0_i32_1] : memref<4x384xf32, #tpu.memory_space<any>> -> memref<1x384xf32, #tpu.memory_space<any>>
    %5 = tpu.memref_squeeze %4 : memref<1x384xf32, #tpu.memory_space<any>> -> memref<384xf32, #tpu.memory_space<any>>
    %c0_i32_2 = arith.constant 0 : i32
    %6 = tpu.memref_slice %arg2[%arg0, %c0_i32_2] : memref<4x384xf32, #tpu.memory_space<any>> -> memref<1x384xf32, #tpu.memory_space<any>>
    %7 = tpu.memref_squeeze %6 : memref<1x384xf32, #tpu.memory_space<any>> -> memref<384xf32, #tpu.memory_space<any>>
    tpu.wait_dma2 semaphore(%arg3 : memref<!tpu.dma_semaphore, #tpu.memory_space<semaphore_mem>>) src(%5 : memref<384xf32, #tpu.memory_space<any>>) dst(%7 : memref<384xf32, #tpu.memory_space<any>>)
    return
  }
}

</mosaic_0001>

<bundles_post_ra>
// kernel: split_cat.1
= control target key start
LH: loop header
LB: loop body
LE: loop exit
PB: predicated region body
PF: predicated region fallthrough
CT: control target
= control target key end

     0   :  { %s117_s6 = smov 0   ;;  %s137_s0 = inlined_call_operand.vmem [shape: f32[4,384], index: 0, kind: input, shape index: {}, may-alias: {0,1}]   ;;  %s138_s1 = inlined_call_operand.vmem [shape: f32[4,384], index: 1, kind: output, shape index: {}, may-alias: {0,1}]  }
   0x1 LB: > { %s13_s7 = sshrl.u32 %s119_s6, 2  ;;  %s14_s8 = sand.u32 3, %s119_s6   ;;  %s119_s6 = sphi %s117_s6, %s11_s6  }
   0x2   : > { %s15_s9 = smul.u32 12, %s13_s7 }
   0x4   : > { %s16_s10 = sadd.s32 %s15_s9, %s14_s8 }
   0x5   : > { %s17_s13 = scalar_lea.vmem %s137_s0, %s16_s10  ;;  %s18_s16 = scalar_lea.vmem %s138_s1, %s16_s10 }
   0x6   : > { %v37_v0 = vld [vmem:[%s17_s13] sm:$0x1] }
   0x7   : > { %38 = vst [vmem:[%s18_s16] sm:$0x1] %v37_v0 }
   0xe   : > { %v39_v1 = vld [vmem:[%s17_s13 + $0x4] sm:$0x1] }
   0xf   : > { %40 = vst [vmem:[%s18_s16 + $0x4] sm:$0x1] %v39_v1 }
  0x16   : > { %v41_v2 = vld [vmem:[%s17_s13 + $0x8] sm:$0x1] }
  0x17   : > { %42 = vst [vmem:[%s18_s16 + $0x8] sm:$0x1] %v41_v2 }
  0x18   : > { %72 = vsyncadd [#allocation2], 48 }
  0x19   : > { %115 = dma.done.wait [#allocation2], 48 }
  0x1a   : > { %116 = vsyncadd [#allocation2], 4294967248  ;;  %s11_s6 = sadd.s32 1, %s119_s6  }
  0x1b   : > { %p8_p0 = scmp.ge.s32.totalorder %s11_s6, 4  }
  0x1d   :  { %10 = sbr.rel (!%p8_p0) target bundleno = 1 (0x1), region = 61 }
  0x22   :  { %75 = vsyncmov [#allocation2] }
  0x25   :  { %s76_s17 = vpop.sfrf %75 }
  0x26   :  { %p102_p1 = scmp.ne.s32.totalorder %s76_s17, 0 }
  0x28   :  { %80 = shalt.err (%p102_p1)  }

</bundles_post_ra>
